<compile_context>
chip_gen: v7x
topology: tpu7x:2x2x1
jax: 0.10.0
libtpu: 0.0.40
codegen_flags: <defaults>
</compile_context>

<pallas_src>
import functools

import jax
import jax.numpy as jnp
import numpy as np
from jax.experimental import pallas as pl
from jax.experimental.pallas import tpu as pltpu


def _round_up(x, m):
    return (x + m - 1) // m * m


def _cdiv(a, b):
    return -(-a // b)


# ---------------------------------------------------------------- Pallas kernel ---

def _mlsm_kernel(pred_ref, tgt_ref, out_ref, *, last_block_rows):
    """One grid step: (tile_rows, C) slab -> (1, 1, C) partial column sums of the BCE."""
    # Inputs arrive in their native (possibly narrow) dtype; upcast is VPU filler under an
    # HBM-bound roofline.
    x = pred_ref[...].astype(jnp.float32)
    y = tgt_ref[...].astype(jnp.float32)

    # Numerically stable BCE-with-logits identity.
    per_elem = jnp.maximum(x, 0.0) - x * y + jnp.log1p(jnp.exp(-jnp.abs(x)))

    def write(pe):
        # Reduce over rows only (mostly vreg-wise VPU adds); lanes stay un-reduced so the
        # per-block partial is written as a lane vector. Final reduction happens in the wrapper.
        out_ref[...] = jnp.sum(pe, axis=0, keepdims=True)[None]

    if last_block_rows is None:
        # No padded rows anywhere: zero masking cost.
        write(per_elem)
    else:
        i = pl.program_id(0)
        last = pl.num_programs(0) - 1

        @pl.when(i != last)
        def _():
            write(per_elem)

        @pl.when(i == last)
        def _():
            row = jax.lax.broadcasted_iota(jnp.int32, x.shape, 0)
            write(jnp.where(row < last_block_rows, per_elem, 0.0))


# --------------------------------------------------------------------- wrapper ---

def multilabel_soft_margin_loss(pred, target, *, rows_cap=None):
    """pred, target: (B, C) -> scalar loss (PyTorch MultiLabelSoftMarginLoss, reduction='mean')."""
    assert pred.ndim == 2 and pred.shape == target.shape
    B, C = pred.shape

    # Row-tile sizing: ~2 MiB of VMEM per input per pipeline buffer. VMEM footprint per row is
    # round_up(C,128) lanes (layout padding), while HBM traffic stays at the real C elements.
    if rows_cap is None:
        itemsize = max(jnp.dtype(pred.dtype).itemsize, jnp.dtype(target.dtype).itemsize)
        c_lanes = _round_up(C, 128)
        rows_cap = max(64, (2 * 1024 * 1024) // (c_lanes * itemsize))
        rows_cap = min(rows_cap, 8192)

    if B <= rows_cap:
        # Single full-extent block: no padding, no masking, one grid step.
        tile_rows, nsteps, b_pad = B, 1, B
    else:
        # Balanced tiles (avoid a nearly-empty tail) rounded to 32 rows (bf16/int8 sublane packing).
        nsteps = _cdiv(B, rows_cap)
        tile_rows = _round_up(_cdiv(B, nsteps), 32)
        nsteps = _cdiv(B, tile_rows)
        b_pad = nsteps * tile_rows

    if b_pad != B:
        # Only tail rows get padded (cheap); padded rows are masked inside the final block.
        pred_in = jnp.pad(pred, ((0, b_pad - B), (0, 0)))
        tgt_in = jnp.pad(target, ((0, b_pad - B), (0, 0)))
        last_block_rows = B - (nsteps - 1) * tile_rows
    else:
        pred_in, tgt_in = pred, target
        last_block_rows = None

    kernel = functools.partial(_mlsm_kernel, last_block_rows=last_block_rows)

    partials = pl.pallas_call(
        kernel,
        out_shape=jax.ShapeDtypeStruct((nsteps, 1, C), jnp.float32),
        grid=(nsteps,),
        in_specs=[
            pl.BlockSpec((tile_rows, C), lambda i: (i, 0)),
            pl.BlockSpec((tile_rows, C), lambda i: (i, 0)),
        ],
        out_specs=pl.BlockSpec((1, 1, C), lambda i: (i, 0, 0)),
        compiler_params=pltpu.CompilerParams(
            dimension_semantics=("parallel",),          # independent partials -> both TCs on v7x
            vmem_limit_bytes=32 * 1024 * 1024,
        ),
    )(pred_in, tgt_in)

    # Tiny final reduction + scaling outside the kernel: loss = sum(BCE) / (B*C).
    return jnp.sum(partials) / (B * C)


# --------------------------------------------------------------- JAX reference ---

def _reference_loss(pred, target):
    logsig_pos = jax.nn.log_sigmoid(pred)
    logsig_neg = jax.nn.log_sigmoid(-pred)
    per_sample = -(target * logsig_pos + (1.0 - target) * logsig_neg).mean(axis=-1)
    return per_sample.mean()


# ------------------------------------------------------------------------ main ---

if __name__ == "__main__":
    key = jax.random.PRNGKey(0)
    kp, kt = jax.random.split(key)

    # Scene-level multi-label logits: 20 semantic classes, batch of 2 scenes.
    B, C = 2, 20
    pred = jax.random.normal(kp, (B, C), jnp.float32)
    target = jax.random.bernoulli(kt, 0.3, (B, C)).astype(jnp.float32)

    loss_fn = jax.jit(multilabel_soft_margin_loss)
    loss = loss_fn(pred, target)
    jax.block_until_ready(loss)
    ref = _reference_loss(pred, target)
    np.testing.assert_allclose(np.asarray(loss), np.asarray(ref), rtol=1e-5, atol=1e-6)

    # Also exercise the multi-step tiled path with a ragged tail (forces tail-row masking).
    B2, C2 = 40, 20
    pred2 = jax.random.normal(kp, (B2, C2), jnp.float32)
    target2 = jax.random.bernoulli(kt, 0.3, (B2, C2)).astype(jnp.float32)
    loss2_fn = jax.jit(functools.partial(multilabel_soft_margin_loss, rows_cap=16))
    loss2 = loss2_fn(pred2, target2)
    jax.block_until_ready(loss2)
    ref2 = _reference_loss(pred2, target2)
    np.testing.assert_allclose(np.asarray(loss2), np.asarray(ref2), rtol=1e-5, atol=1e-6)

    print("KERNEL_OK")
</pallas_src>

<mosaic_0001>
module attributes {stable_mosaic.version = 11 : i64} {
  func.func @_mlsm_kernel(%arg0: i32, %arg1: memref<2x20xf32, #tpu.memory_space<vmem>>, %arg2: memref<2x20xf32, #tpu.memory_space<vmem>>, %arg3: memref<1x1x20xf32, #tpu.memory_space<vmem>>) attributes {dimension_semantics = [#tpu.dimension_semantics<parallel>], iteration_bounds = array<i64: 1>, scalar_prefetch = 0 : i64, scratch_operands = 0 : i64, tpu.core_type = #tpu.core_type<tc>, window_params = [{transform_indices = @transform_0, window_bounds = array<i64: 2, 20>}, {transform_indices = @transform_1, window_bounds = array<i64: 2, 20>}, {transform_indices = @transform_2, window_bounds = array<i64: 1, 1, 20>}]} {
    %c0 = arith.constant 0 : index
    %c0_0 = arith.constant 0 : index
    %0 = vector.load %arg1[%c0, %c0_0] : memref<2x20xf32, #tpu.memory_space<vmem>>, vector<2x20xf32>
    %c0_1 = arith.constant 0 : index
    %c0_2 = arith.constant 0 : index
    %1 = vector.load %arg2[%c0_1, %c0_2] : memref<2x20xf32, #tpu.memory_space<vmem>>, vector<2x20xf32>
    %cst = arith.constant 0.000000e+00 : f32
    %2 = vector.broadcast %cst : f32 to vector<2x20xf32>
    %3 = arith.maximumf %0, %2 : vector<2x20xf32>
    %4 = arith.mulf %0, %1 : vector<2x20xf32>
    %5 = arith.subf %3, %4 : vector<2x20xf32>
    %6 = math.absf %0 : vector<2x20xf32>
    %cst_3 = arith.constant 0.000000e+00 : f32
    %7 = vector.broadcast %cst_3 : f32 to vector<2x20xf32>
    %8 = arith.subf %7, %6 : vector<2x20xf32>
    %9 = math.exp %8 : vector<2x20xf32>
    %10 = math.log1p %9 : vector<2x20xf32>
    %11 = arith.addf %5, %10 : vector<2x20xf32>
    %cst_4 = arith.constant dense<0.000000e+00> : vector<20xf32>
    %12 = vector.multi_reduction <add>, %11, %cst_4 [0] : vector<2x20xf32> to vector<20xf32>
    %13 = vector.shape_cast %12 : vector<20xf32> to vector<1x20xf32>
    %14 = vector.shape_cast %13 : vector<1x20xf32> to vector<1x1x20xf32>
    %c0_5 = arith.constant 0 : index
    %c0_6 = arith.constant 0 : index
    %c0_7 = arith.constant 0 : index
    %15 = vector.load %arg3[%c0_5, %c0_6, %c0_7] : memref<1x1x20xf32, #tpu.memory_space<vmem>>, vector<1x1x20xf32>
    tpu.vector_store %arg3[%c0_5, %c0_6, %c0_7], %14 {strides = array<i32>} : memref<1x1x20xf32, #tpu.memory_space<vmem>>, vector<1x1x20xf32>,
    return
  }
  func.func @transform_0(%arg0: i32) -> (i32, i32) {
    %c0_i32 = arith.constant 0 : i32
    %c0_i32_0 = arith.constant 0 : i32
    return %arg0, %c0_i32 : i32, i32
  }
  func.func @transform_1(%arg0: i32) -> (i32, i32) {
    %c0_i32 = arith.constant 0 : i32
    %c0_i32_0 = arith.constant 0 : i32
    return %arg0, %c0_i32 : i32, i32
  }
  func.func @transform_2(%arg0: i32) -> (i32, i32, i32) {
    %c0_i32 = arith.constant 0 : i32
    %c0_i32_0 = arith.constant 0 : i32
    %c0_i32_1 = arith.constant 0 : i32
    return %arg0, %c0_i32, %c0_i32_0 : i32, i32, i32
  }
}

</mosaic_0001>

<bundles_post_ra>
// kernel: multilabel_soft_margin_loss.1
= control target key start
LH: loop header
LB: loop body
LE: loop exit
PB: predicated region body
PF: predicated region fallthrough
CT: control target
= control target key end

     0   :  { %7 = vsyncpa [#allocation3], 0  ;;  %s86_s9 = smov [#allocation2]   ;;  %s120_s0 = inlined_call_operand.hbm [shape: f32[2,20], index: 0, kind: input, shape index: {}]   ;;  %s121_s1 = inlined_call_operand.vmem [shape: f32[2,20], index: 1, kind: input, shape index: {}]   ;;  %s122_s2 = inlined_call_operand.vmem [shape: f32[1,1,20], index: 2, kind: output, shape index: {}]  }
   0x1   :  { %s14_s10 = sshll.u32 %s86_s9, 4  ;;  %s62_s13 = scalar_lea.hbm %s120_s0, 32  ;;  %s15_s10 = int_to_ptr.vmem [resolvable:$true] %s14_s10 }
   0x2   :  { %p63_p0 = scmp.ne.s32.totalorder %s120_s0, %s62_s13  ;;  %p66_p1 = scmp.lt.u32.totalorder %s62_s13, %s120_s0 }
   0x4   :  { %p68_p2 = pnand %p66_p1, %p63_p0 }
   0x6   :  { %71 = shalt.err (!%p68_p2)
}
   0x7   :  { %s72_s18 = scalar_lea.vmem %s15_s10, 32  ;;  %p77_p4 = scmp.lt.s32.totalorder %s15_s10, %s15_s10 }
   0x8   :  { %p73_p3 = scmp.ne.s32.totalorder %s15_s10, %s72_s18  ;;  %p78_p5 = scmp.lt.s32.totalorder %s72_s18, %s72_s18 }
   0xa   :  { %p79_p6 = por %p78_p5, %p77_p4 }
   0xc   :  { %p80_p7 = pnand %p79_p6, %p73_p3 }
   0xe   :  { %83 = shalt.err (!%p80_p7)
}
   0xf   :  { %17 = dma.hbm_to_vmem [thread:$0]  %s120_s0, 32, %s15_s10, [#allocation3]  }
  0x10   :  { %84 = dma.done.wait [#allocation3], 32  }
  0x11   :  { %85 = vsyncadd [#allocation3], 4294967264  ;;  %v23_v0 = vld [vmem:[#allocation2] sm:$0x3]  ;;  %vm42_vm1 = vcmask 156672   ;;  %vm50_vm2 = vcmask 155648  }
  0x12   :  { %v28_v1 = vand.u32 2147483647, %v23_v0  ;;  %v24_v7 = vld [vmem:[%s121_s1] sm:$0x3]  ;;  %v25_v9 = vmax.f32 %v23_v0, 0.0 }
  0x13   :  { %v26_v10 = vmul.f32 %v24_v7, %v23_v0 }
  0x14   :  { %v29_v2 = vsub.f32 0.0, %v28_v1 }
  0x15   :  { %v27_v14 = vsub.f32 %v25_v9, %v26_v10 }
  0x16   :  { %v30_v3 = vmul.f32 1.442695, %v29_v2 }
  0x18   :  { %58 = vpow2.f32 %v30_v3 }
  0x22   :  { %v59_v4 = vpop.eup %58 }
  0x23   :  { %v32_v5 = vadd.f32 1.0, %v59_v4  ;;  %v35_v6 = vmul.f32 -0.5, %v59_v4  ;;  %v38_v11 = vand.u32 2147483647, %v59_v4 }
  0x25   :  { %60 = vlog2.f32 %v32_v5  ;;  %v36_v8 = vadd.f32 1.0, %v35_v6  ;;  %vm39_vm0 = vcmp.lt.f32.partialorder %v38_v11, 0.0004427343 }
  0x27   :  { %v37_v12 = vmul.f32 %v59_v4, %v36_v8 }
  0x2f   :  { %v61_v13 = vpop.eup %60 }
  0x30   :  { %v34_v15 = vmul.f32 0.6931472, %v61_v13 }
  0x32   :  { %v40_v16 = vsel %vm39_vm0, %v37_v12, %v34_v15 }
  0x33   :  { %v41_v17 = vadd.f32 %v40_v16, %v27_v14 }
  0x35   :  { %v43_v18 = vsel %vm42_vm1, %v41_v17, 0.0 }
  0x36   :  { %v44_v19 = vrot.slane %v43_v18, 4 }
  0x38   :  { %v45_v20 = vadd.f32 %v44_v19, %v43_v18 }
  0x3a   :  { %v46_v21 = vrot.slane %v45_v20, 2 }
  0x3c   :  { %v47_v22 = vadd.f32 %v46_v21, %v45_v20 }
  0x3e   :  { %v48_v23 = vrot.slane %v47_v22, 1 }
  0x40   :  { %v49_v24 = vadd.f32 %v48_v23, %v47_v22 }
  0x42   :  { %51 = vst.msk [vmem:[%s122_s2] sm:$0x1] %vm50_vm2, %v49_v24 }
  0x43   :  { %56 = vsyncpa [#allocation3], 1 }

</bundles_post_ra>
